<compile_context>
chip_gen: v6e
topology: v6e:2x2x1
jax: 0.10.0
libtpu: 0.0.40
codegen_flags: <defaults>
</compile_context>

<pallas_src>
import jax
import jax.numpy as jnp
from jax.experimental import pallas as pl
from jax.experimental.pallas import tpu as pltpu


def _relu_kernel(x_ref, o_ref):
    # maximum against a weak-typed scalar 0 -> dtype preserved, no zero tile.
    o_ref[...] = jnp.maximum(x_ref[...], 0)


def _cdiv(a: int, b: int) -> int:
    return -(-a // b)


def _round_up(a: int, b: int) -> int:
    return _cdiv(a, b) * b


def _default_block_bytes() -> int:
    # ~4 MiB blocks on v7x (higher HBM BW makes per-step overhead relatively
    # larger; 4 MiB * 2 arrays * 2 buffers = 16 MiB < 32 MiB scoped default).
    # 2 MiB elsewhere (8 MiB total fits v5e's 16 MiB scoped-VMEM default).
    try:
        kind = jax.devices()[0].device_kind.lower()
    except Exception:
        return 2 << 20
    return (4 << 20) if "v7" in kind else (2 << 20)


def _choose_tiles(rows: int, lanes: int, itemsize: int, sub: int,
                  target_block_bytes: int):
    """Pick (tile_rows, tile_lanes).  `lanes` is always a multiple of 128."""
    if lanes * itemsize * sub <= target_block_bytes:
        tile_lanes = lanes
        budget_rows = max(sub,
                          (target_block_bytes // (lanes * itemsize)) // sub * sub)
        if rows >= sub:
            tile_rows = max(sub, min(rows // sub * sub, budget_rows))
        else:
            tile_rows = rows  # equals full dim -> allowed by (8,128) rule
    else:
        # Very wide minor dim: one sublane group of rows, tile the lane dim.
        tile_rows = rows if rows < sub else sub
        tile_lanes = (target_block_bytes // (tile_rows * itemsize)) // 128 * 128
        tile_lanes = max(128, min(tile_lanes, lanes))

    # Guarantee >= 2 grid steps whenever possible so the "parallel" axes can
    # shard across v7x's two TensorCores (free on single-TC v5e/v6e).
    steps = _cdiv(rows, tile_rows) * _cdiv(lanes, tile_lanes)
    if steps < 2:
        if rows >= 2 * sub:
            tile_rows = min(tile_rows, _round_up(_cdiv(rows, 2), sub))
        elif tile_lanes == lanes and lanes >= 256:
            tile_lanes = _round_up(_cdiv(lanes, 2), 128)
    return tile_rows, tile_lanes


def _relu_2d(x2d: jax.Array, tile_rows: int, tile_lanes: int) -> jax.Array:
    rows, lanes = x2d.shape
    itemsize = jnp.dtype(x2d.dtype).itemsize
    grid = (_cdiv(rows, tile_rows), _cdiv(lanes, tile_lanes))
    return pl.pallas_call(
        _relu_kernel,
        out_shape=jax.ShapeDtypeStruct((rows, lanes), x2d.dtype),
        grid=grid,
        in_specs=[pl.BlockSpec((tile_rows, tile_lanes), lambda i, j: (i, j))],
        out_specs=pl.BlockSpec((tile_rows, tile_lanes), lambda i, j: (i, j)),
        compiler_params=pltpu.CompilerParams(
            dimension_semantics=("parallel", "parallel")),
        cost_estimate=pl.CostEstimate(
            flops=rows * lanes,
            transcendentals=0,
            bytes_accessed=2 * rows * lanes * itemsize),
    )(x2d)


def relu_pallas(x: jax.Array, *, target_block_bytes: int | None = None) -> jax.Array:
    """Elementwise ReLU.  Accepts any shape/dtype; matches torch.nn.ReLU."""
    orig_shape = x.shape
    n = x.size
    if n == 0:
        return x

    itemsize = jnp.dtype(x.dtype).itemsize
    # Sub-32-bit dtypes pack along sublanes in pairs/quads.
    sub = {4: 8, 2: 16, 1: 32}.get(itemsize, 8)
    if target_block_bytes is None:
        target_block_bytes = _default_block_bytes()

    if x.ndim >= 2 and x.shape[-1] % 128 == 0:
        # Layout-preserving collapse: fold only leading dims into rows.  This
        # keeps the (8,128)-tiled HBM layout, so no relayout copy is inserted
        # before the pallas_call (true 1x HBM traffic).
        lanes = x.shape[-1]
        rows = n // lanes
        x2d = x.reshape(rows, lanes)
    elif n % 128 == 0:
        # Minor dim isn't lane-aligned: fall back to the widest lane-dense
        # divisor of n so stores inside the kernel stay unmasked.
        lanes = next(w for w in (2048, 1024, 512, 256, 128) if n % w == 0)
        rows = n // lanes
        x2d = x.reshape(rows, lanes)
    else:
        # Not a multiple of 128: a Pallas path would need pad+slice (~3x HBM
        # traffic).  Plain XLA maximum already sits at the HBM roofline.
        return jnp.maximum(x, 0)

    tile_rows, tile_lanes = _choose_tiles(rows, lanes, itemsize, sub,
                                          target_block_bytes)
    out2d = _relu_2d(x2d, tile_rows, tile_lanes)
    return out2d.reshape(orig_shape)


if __name__ == "__main__":
    # Primary check: NCHW input consistent with the PyTorch module.
    x = jax.random.normal(jax.random.PRNGKey(0), (2, 4, 16, 16), dtype=jnp.float32)
    y = relu_pallas(x)
    jax.block_until_ready(y)
    assert y.shape == x.shape and y.dtype == x.dtype
    assert jnp.allclose(y, jnp.maximum(x, 0.0)), "mismatch (lane-divisor path)"

    # Layout-preserving path: minor dim already a multiple of 128 (bf16).
    x2 = jax.random.normal(jax.random.PRNGKey(1), (4, 8, 256), dtype=jnp.bfloat16)
    y2 = relu_pallas(x2)
    jax.block_until_ready(y2)
    assert y2.shape == x2.shape and y2.dtype == x2.dtype
    assert jnp.allclose(y2, jnp.maximum(x2, 0)), "mismatch (layout-preserving path)"

    # Non-multiple-of-128 size: handled by plain jnp.maximum in the wrapper.
    x3 = jax.random.normal(jax.random.PRNGKey(2), (3, 5, 7), dtype=jnp.float32)
    y3 = relu_pallas(x3)
    jax.block_until_ready(y3)
    assert y3.shape == x3.shape and y3.dtype == x3.dtype
    assert jnp.allclose(y3, jnp.maximum(x3, 0.0)), "mismatch (XLA tail path)"

    print("KERNEL_OK")
</pallas_src>

<mosaic_0001>
module attributes {stable_mosaic.version = 11 : i64} {
  func.func @_relu_kernel(%arg0: i32, %arg1: i32, %arg2: memref<1x1024xf32, #tpu.memory_space<vmem>>, %arg3: memref<1x1024xf32, #tpu.memory_space<vmem>>) attributes {dimension_semantics = [#tpu.dimension_semantics<parallel>, #tpu.dimension_semantics<parallel>], iteration_bounds = array<i64: 1, 2>, scalar_prefetch = 0 : i64, scratch_operands = 0 : i64, tpu.core_type = #tpu.core_type<tc>, window_params = [{transform_indices = @transform_0, window_bounds = array<i64: 1, 1024>}, {transform_indices = @transform_1, window_bounds = array<i64: 1, 1024>}]} {
    %c0 = arith.constant 0 : index
    %c0_0 = arith.constant 0 : index
    %0 = vector.load %arg2[%c0, %c0_0] : memref<1x1024xf32, #tpu.memory_space<vmem>>, vector<1x1024xf32>
    %cst = arith.constant 0.000000e+00 : f32
    %1 = vector.broadcast %cst : f32 to vector<1x1024xf32>
    %2 = arith.maximumf %0, %1 : vector<1x1024xf32>
    %c0_1 = arith.constant 0 : index
    %c0_2 = arith.constant 0 : index
    %3 = vector.load %arg3[%c0_1, %c0_2] : memref<1x1024xf32, #tpu.memory_space<vmem>>, vector<1x1024xf32>
    tpu.vector_store %arg3[%c0_1, %c0_2], %2 {strides = array<i32>} : memref<1x1024xf32, #tpu.memory_space<vmem>>, vector<1x1024xf32>,
    return
  }
  func.func @transform_0(%arg0: i32, %arg1: i32) -> (i32, i32) {
    %c0_i32 = arith.constant 0 : i32
    return %arg0, %arg1 : i32, i32
  }
  func.func @transform_1(%arg0: i32, %arg1: i32) -> (i32, i32) {
    %c0_i32 = arith.constant 0 : i32
    return %arg0, %arg1 : i32, i32
  }
}

</mosaic_0001>

<bundles_post_ra>
// kernel: tpu_custom_call.1
= control target key start
LH: loop header
LB: loop body
LE: loop exit
PB: predicated region body
PF: predicated region fallthrough
CT: control target
= control target key end

     0   :  { %6 = vsyncpa [#allocation3], 0  ;;  %s592_s0 = inlined_call_operand.hbm [shape: f32[1,2048], index: 0, kind: input, shape index: {}]   ;;  %s593_s1 = inlined_call_operand.hbm [shape: f32[1,2048], index: 1, kind: output, shape index: {}]  }
   0x1   :  { %8 = vsyncpa [#allocation3 + $0x1], 0 }
   0x2   :  { %9 = vsyncpa [#allocation4], 0 }
   0x3   :  { %11 = vsyncpa [#allocation4 + $0x1], 0  ;;  %s458_s6 = smov 0   ;;  %s460_s7 = smov 0  }
   0x4   :  { %s462_s8 = smov 0   ;;  %s464_s9 = smov 0  }
   0x5   :  { %s466_s10 = smov 0   ;;  %s468_s11 = smov 0  }
   0x6 LB: > { %s257_s12 = sadd.s32 4294967295, %s444_s11   ;;  %s258_s13 = sadd.s32 4294967294, %s444_s11   ;;  %s444_s11 = sphi %s468_s11, %s17_s11   ;;  %s440_s10 = sphi %s466_s10, %s605_s10   ;;  %s436_s9 = sphi %s464_s9, %s604_s9   ;;  %s432_s8 = sphi %s462_s8, %s603_s8   ;;  %s428_s7 = sphi %s460_s7, %s602_s7   ;;  %s424_s6 = sphi %s458_s6, %s601_s6  }
   0x7   : > { %s26_s14 = sadd.s32 1, %s440_s10  ;;  %s38_s15 = sadd.s32 1, %s432_s8 }
   0x8   : > { %p27_p0 = scmp.ge.s32.totalorder %s26_s14, 2  ;;  %p45_p1 = scmp.ne.s32.totalorder %s432_s8, %s428_s7 }
   0x9   : > { %p46_p2 = scmp.eq.s32.totalorder %s444_s11, 0  ;;  %p51_p3 = scmp.ne.s32.totalorder %s428_s7, %s424_s6 }
   0xa   : > { %s607_s14 = smov (%p27_p0, %s26_s14), 0  ;;  %p52_p5 = scmp.eq.s32.totalorder %s257_s12, 0 }
   0xb   : > { %p499_p4 = por %p46_p2, %p45_p1  ;;  %s34_s17 = ssub.s32 %s440_s10, %s607_s14 }
   0xc   : > { %p77_p6 = scmp.eq.s32.totalorder %s257_s12, 1  ;;  %p36_p7 = scmp.eq.s32.totalorder %s34_s17, 0 }
   0xd   : > { %p505_p8 = por %p52_p5, %p51_p3  ;;  %p83_p10 = scmp.eq.s32.totalorder %s258_s13, 1 }
   0xe   : > { %p509_p9 = por %p77_p6, %p45_p1  ;;  %p286_p13 = scmp.lt.s32.totalorder %s444_s11, 2 }
   0xf   : > { %s514_s20 = scalar_select %p36_p7, %s432_s8, %s38_s15  }
  0x10   : > { %p516_p11 = por %p83_p10, %p51_p3  ;;  %s103_s22 = sand.u32 1, %s432_s8  }
  0x11   : > { %s261_s23 = sshll.u32 %s103_s22, 3  ;;  %s272_s24 = sshll.u32 %s440_s10, 7 }
  0x12   : > { %s597_s21 = scalar_select %p516_p11, 1, 0 }
  0x13   : > { %s115_s27 = scalar_lea.hbm %s592_s0, %s272_s24  ;;  %s107_s28 = scalar_lea.vmem [#allocation2], %s261_s23 }
  0x14   : > { %s117_s29 = sshll.u32 %s107_s28, 4  ;;  %p529_p0 = pnand %p286_p13, %p499_p4  ;;  %s118_s29 = int_to_ptr.vmem [resolvable:$true] %s117_s29 }
  0x15   : > { %p264_p1 = scmp.ge.s32.totalorder %s444_s11, 1  ;;  %p122_p2 = scmp.lt.s32.totalorder %s444_s11, 3 }
  0x16   : > { %s104_s2 = scalar_lea.sflag [#allocation3], %s103_s22  ;;  %p338_p3 = pneg %p529_p0 }
  0x17   : > { %s349_s3 = scalar_lea.vmem %s118_s29, 128  ;;  %s446_s4 = smov [#allocation2]  }
  0x18   : > { %p350_p5 = scmp.ne.s32.totalorder %s118_s29, %s349_s3  ;;  %s354_s5 = sshll.u32 %s446_s4, 4  ;;  %s355_s5 = int_to_ptr.vmem [resolvable:$false] %s354_s5 }
  0x19   : > { %s356_s12 = scalar_lea.vmem %s355_s5, 256  ;;  %p357_p10 = scmp.lt.s32.totalorder %s118_s29, %s355_s5 }
  0x1a   : > { %p352_p6 = pnand %p350_p5, %p338_p3  ;;  %p358_p12 = scmp.lt.s32.totalorder %s356_s12, %s349_s3 }
  0x1c   : > { %p353_p7 = pneg %p352_p6  ;;  %p359_p4 = por %p358_p12, %p357_p10 }
  0x1e   : > { %p360_p13 = pnand %p359_p4, %p353_p7 }
  0x20   : > { %363 = shalt.err (!%p360_p13)
}
  0x21   : > { %281 = dma.hbm_to_vmem [thread:$0]  (!%p529_p0), %s115_s27, 128, %s118_s29, %s104_s2  }
  0x22   : > { %p123_p11 = pnand %p264_p1, %p122_p2 }
  0x23   : > { %s544_s13 = sand.u32 (!%p123_p11), 1, %s428_s7  }
  0x24   : > { %126 = sbr.rel (%p123_p11) target bundleno = 66 (0x42), region = 24  ;;  %s265_s15 = sshll.u32 (!%p123_p11), %s544_s13, 3 }
  0x25   : > { %s129_s16 = scalar_lea.sflag (!%p123_p11), [#allocation3], %s544_s13  ;;  %s132_s17 = scalar_lea.vmem (!%p123_p11), [#allocation2], %s265_s15 }
  0x29   : > { %415 = dma.done.wait (%p505_p8), %s129_s16, 128  }
  0x2a   : > { %417 = vsyncadd (%p505_p8), %s129_s16, 4294967168  ;;  %s150_s22 = scalar_lea.vmem [#allocation5], %s265_s15  ;;  %s273_s24 = sshll.u32 %s436_s9, 7  ;;  %v153_v0 = vld [vmem:[%s132_s17] sm:$0xff] }
  0x2b   : > { %s173_s23 = sshll.u32 %s150_s22, 4  ;;  %v154_v1 = vmax.f32 %v153_v0, 0.0  ;;  %s171_s27 = scalar_lea.hbm %s593_s1, %s273_s24  ;;  %s174_s23 = int_to_ptr.vmem [resolvable:$true] %s173_s23 }
  0x2c   : > { %s157_s28 = scalar_lea.sflag [#allocation4], %s544_s13  ;;  %s364_s29 = scalar_lea.vmem %s174_s23, 128 }
  0x2d   : > { %155 = vst [vmem:[%s150_s22] sm:$0xff] %v154_v1  ;;  %p365_p11 = scmp.ne.s32.totalorder %s174_s23, %s364_s29  ;;  %s447_s18 = smov [#allocation5]  }
  0x2e   : > { %s368_s30 = sshll.u32 %s447_s18, 4  ;;  %s369_s30 = int_to_ptr.vmem [resolvable:$false] %s368_s30 }
  0x2f   : > { %p366_p12 = pnand %p365_p11, %p509_p9  ;;  %s370_s2 = scalar_lea.vmem %s369_s30, 256 }
  0x30   : > { %p371_p0 = scmp.lt.s32.totalorder %s174_s23, %s369_s30  ;;  %p372_p1 = scmp.lt.s32.totalorder %s370_s2, %s364_s29 }
  0x31   : > { %p367_p8 = pneg %p366_p12 }
  0x32   : > { %p373_p2 = por %p372_p1, %p371_p0 }
  0x34   : > { %p374_p3 = pnand %p373_p2, %p367_p8 }
  0x36   : > { %377 = shalt.err (!%p374_p3)
}
  0x37   : > { %s378_s9 = scalar_lea.hbm %s171_s27, 128  ;;  %s382_s5 = scalar_lea.hbm %s593_s1, 256 }
  0x38   : > { %p379_p5 = scmp.ne.s32.totalorder %s171_s27, %s378_s9  ;;  %p383_p10 = scmp.lt.s32.totalorder %s171_s27, %s593_s1 }
  0x39   : > { %p384_p4 = scmp.lt.s32.totalorder %s382_s5, %s378_s9 }
  0x3a   : > { %p380_p6 = pnand %p379_p5, %p509_p9 }
  0x3b   : > { %p385_p13 = por %p384_p4, %p383_p10 }
  0x3c   : > { %p381_p7 = pneg %p380_p6 }
  0x3e   : > { %p386_p11 = pnand %p385_p13, %p381_p7 }
  0x40   : > { %389 = shalt.err (!%p386_p11)
}
  0x41   : > { %276 = dma.vmem_to_hbm [thread:$0]  (%p509_p9), %s174_s23, 128, %s171_s27, %s157_s28  }
  0x42 PF: > { %s185_s15 = sand.u32 1, %s424_s6   ;;  %p599_p12 = scmp.ne.s32.totalorder %s597_s21, 0 }
  0x43   : > { %p600_p8 = scmp.ge.s32.totalorder %s444_s11, 2  ;;  %s186_s16 = scalar_lea.sflag [#allocation4], %s185_s15 }
  0x45   : > { %p283_p0 = pnand %p600_p8, %p599_p12 }
  0x47   : > { %p284_p1 = pneg %p283_p0 }
  0x49   : > { %419 = dma.done.wait (%p284_p1), %s186_s16, 128  }
  0x4a   : > { %421 = vsyncadd (%p284_p1), %s186_s16, 4294967168  ;;  %s17_s11 = sadd.s32 1, %s444_s11   ;;  %s601_s6 = smov %s428_s7 }
  0x4b   : > { %p14_p2 = scmp.ge.s32.totalorder %s17_s11, 4   ;;  %s602_s7 = smov %s432_s8 }
  0x4c   : > { %s603_s8 = smov %s514_s20  ;;  %s604_s9 = smov %s440_s10 }
  0x4d   : > { %s605_s10 = smov %s607_s14  ;;  %16 = sbr.rel (!%p14_p2) target bundleno = 6 (0x6), region = 69 }
  0x52   :  { %191 = vsyncpa [#allocation3], 1 }
  0x53   :  { %193 = vsyncpa [#allocation3 + $0x1], 1 }
  0x54   :  { %194 = vsyncpa [#allocation4], 1 }
  0x55   :  { %196 = vsyncpa [#allocation4 + $0x1], 1 }

</bundles_post_ra>
